<compile_context>
chip_gen: v6e
topology: v6e:2x2x1
jax: 0.10.0
libtpu: 0.0.40
codegen_flags: <defaults>
</compile_context>

<pallas_src>
import jax
import jax.numpy as jnp
from jax.experimental import pallas as pl
from jax.experimental.pallas import tpu as pltpu


LANES = 128              # vreg lane width
MAX_TILE_ROWS = 2048     # 2048 * 128 * 4 B = 1 MiB per f32 buffer


def _copy_kernel(x_ref, o_ref):
    # Identity placeholder: AuxGripperModule defines no transformation.
    o_ref[...] = x_ref[...]


def aux_gripper_forward(batch: dict, *, use_kernel: bool = True) -> jax.Array:
    """JAX/Pallas equivalent of AuxGripperModule.forward.

    The abstract module defines no computation, so semantics are identity on
    the batch's 'img' tensor.  With use_kernel=False the kernel is elided
    entirely (the recommended production path for a pure identity); with
    use_kernel=True a lane-dense, tiled, pipelined Pallas copy runs as the
    placeholder for subclass compute.
    """
    img = batch["img"]
    if not use_kernel:
        return img  # fastest identity: no HBM round trip at all

    orig_shape = img.shape
    flat = img.reshape(-1)
    total = flat.shape[0]

    # ---- lane-dense 2-D slab: last dim maps to the 128-wide lane axis ----
    rows = pl.cdiv(total, LANES)
    padded_elems = rows * LANES
    if padded_elems > total:
        flat = jnp.pad(flat, (0, padded_elems - total))

    # ---- pick tile: full array if small, else 1 MiB (2048x128) blocks ----
    if rows <= MAX_TILE_ROWS:
        tile_rows = rows                      # single full block (always legal)
        grid_rows = rows
    else:
        tile_rows = MAX_TILE_ROWS
        n_tiles = pl.cdiv(rows, tile_rows)
        grid_rows = n_tiles * tile_rows
        if grid_rows > rows:
            flat = jnp.pad(flat, (0, (grid_rows - rows) * LANES))

    x2d = flat.reshape(grid_rows, LANES)
    n_tiles = grid_rows // tile_rows

    out2d = pl.pallas_call(
        _copy_kernel,
        out_shape=jax.ShapeDtypeStruct(x2d.shape, x2d.dtype),
        grid=(n_tiles,),
        in_specs=[pl.BlockSpec((tile_rows, LANES), lambda i: (i, 0))],
        out_specs=pl.BlockSpec((tile_rows, LANES), lambda i: (i, 0)),
        compiler_params=pltpu.CompilerParams(
            # single axis, independent tiles -> shard across TCs (v7x megacore)
            dimension_semantics=("parallel",),
            # explicit, generation-safe cap: tiles use ~4 MiB double-buffered
            vmem_limit_bytes=32 * 1024 * 1024,
        ),
    )(x2d)

    out_flat = out2d.reshape(-1)
    if out_flat.shape[0] != total:
        out_flat = out_flat[:total]
    return out_flat.reshape(orig_shape)


if __name__ == "__main__":
    key = jax.random.PRNGKey(0)
    # Small image-like batch consistent with a gripper-vision module: NCHW.
    img = jax.random.normal(key, (2, 4, 16, 16), dtype=jnp.float32)
    batch = {"img": img}

    out = aux_gripper_forward(batch, use_kernel=True)
    out = jax.block_until_ready(out)

    assert out.shape == img.shape and out.dtype == img.dtype
    assert bool(jnp.allclose(out, img)), "pass-through mismatch"
    print("KERNEL_OK")
</pallas_src>

<mosaic_0001>
module attributes {stable_mosaic.version = 11 : i64} {
  func.func @_copy_kernel(%arg0: i32, %arg1: memref<16x128xf32, #tpu.memory_space<vmem>>, %arg2: memref<16x128xf32, #tpu.memory_space<vmem>>) attributes {dimension_semantics = [#tpu.dimension_semantics<parallel>], iteration_bounds = array<i64: 1>, scalar_prefetch = 0 : i64, scratch_operands = 0 : i64, tpu.core_type = #tpu.core_type<tc>, window_params = [{transform_indices = @transform_0, window_bounds = array<i64: 16, 128>}, {transform_indices = @transform_1, window_bounds = array<i64: 16, 128>}]} {
    %c0 = arith.constant 0 : index
    %c0_0 = arith.constant 0 : index
    %0 = vector.load %arg1[%c0, %c0_0] : memref<16x128xf32, #tpu.memory_space<vmem>>, vector<16x128xf32>
    %c0_1 = arith.constant 0 : index
    %c0_2 = arith.constant 0 : index
    %1 = vector.load %arg2[%c0_1, %c0_2] : memref<16x128xf32, #tpu.memory_space<vmem>>, vector<16x128xf32>
    tpu.vector_store %arg2[%c0_1, %c0_2], %0 {strides = array<i32>} : memref<16x128xf32, #tpu.memory_space<vmem>>, vector<16x128xf32>,
    return
  }
  func.func @transform_0(%arg0: i32) -> (i32, i32) {
    %c0_i32 = arith.constant 0 : i32
    %c0_i32_0 = arith.constant 0 : i32
    return %arg0, %c0_i32 : i32, i32
  }
  func.func @transform_1(%arg0: i32) -> (i32, i32) {
    %c0_i32 = arith.constant 0 : i32
    %c0_i32_0 = arith.constant 0 : i32
    return %arg0, %c0_i32 : i32, i32
  }
}

</mosaic_0001>

<bundles_post_ra>
// kernel: tpu_custom_call.1
= control target key start
LH: loop header
LB: loop body
LE: loop exit
PB: predicated region body
PF: predicated region fallthrough
CT: control target
= control target key end

     0   :  { %6 = vsyncpa [#allocation3], 0  ;;  %s112_s0 = inlined_call_operand.hbm [shape: f32[16,128], index: 0, kind: input, shape index: {}]   ;;  %s113_s1 = inlined_call_operand.hbm [shape: f32[16,128], index: 1, kind: output, shape index: {}]  }
   0x1   :  { %7 = vsyncpa [#allocation4], 0  ;;  %s92_s6 = smov [#allocation2]  }
   0x2   :  { %s13_s7 = sshll.u32 %s92_s6, 4  ;;  %s14_s7 = int_to_ptr.vmem [resolvable:$true] %s13_s7 }
   0x3   :  { %s56_s8 = scalar_lea.vmem %s14_s7, 256  ;;  %p61_p1 = scmp.lt.s32.totalorder %s14_s7, %s14_s7 }
   0x4   :  { %p57_p0 = scmp.ne.s32.totalorder %s14_s7, %s56_s8  ;;  %p62_p2 = scmp.lt.s32.totalorder %s56_s8, %s56_s8 }
   0x6   :  { %p63_p3 = por %p62_p2, %p61_p1 }
   0x8   :  { %p64_p4 = pnand %p63_p3, %p57_p0 }
   0xa   :  { %67 = shalt.err (!%p64_p4)
}
   0xb   :  { %s93_s9 = smov 128   ;;  %s94_s10 = smov 8  }
   0xc   :  { %19 = dma.hbm_to_vmem [thread:$0]  %s112_s0, 256, %s14_s7, [#allocation3], %s93_s9, %s93_s9, %s94_s10  }
   0xd   :  { %88 = dma.done.wait [#allocation3], 256  }
   0xe   :  { %89 = vsyncadd [#allocation3], 4294967040  ;;  %s95_s13 = smov [#allocation5]   ;;  %v23_v0 = vld [vmem:[#allocation2] sm:$0xff]  ;;  %v24_v1 = vld [vmem:[#allocation2 + $0x8] sm:$0xff] }
   0xf   :  { %s32_s14 = sshll.u32 %s95_s13, 4  ;;  %25 = vst [vmem:[#allocation5] sm:$0xff] %v23_v0  ;;  %26 = vst [vmem:[#allocation5 + $0x8] sm:$0xff] %v24_v1  ;;  %s33_s14 = int_to_ptr.vmem [resolvable:$true] %s32_s14 }
  0x10   :  { %s68_s15 = scalar_lea.vmem %s33_s14, 256  ;;  %p73_p6 = scmp.lt.s32.totalorder %s33_s14, %s33_s14 }
  0x11   :  { %p69_p5 = scmp.ne.s32.totalorder %s33_s14, %s68_s15  ;;  %p74_p7 = scmp.lt.s32.totalorder %s68_s15, %s68_s15 }
  0x13   :  { %p75_p8 = por %p74_p7, %p73_p6 }
  0x15   :  { %p76_p9 = pnand %p75_p8, %p69_p5 }
  0x17   :  { %79 = shalt.err (!%p76_p9)
}
  0x18   :  { %38 = dma.vmem_to_hbm [thread:$0]  %s33_s14, 256, %s113_s1, [#allocation4], %s93_s9, %s93_s9, %s94_s10  }
  0x19   :  { %90 = dma.done.wait [#allocation4], 256  }
  0x1a   :  { %91 = vsyncadd [#allocation4], 4294967040 }
  0x1b   :  { %42 = vsyncpa [#allocation3], 1 }
  0x1c   :  { %43 = vsyncpa [#allocation4], 1 }

</bundles_post_ra>
